<compile_context>
chip_gen: v5e
topology: v5e:2x2
jax: 0.10.0
libtpu: 0.0.40
codegen_flags: <defaults>
</compile_context>

<pallas_src>
import jax
import jax.numpy as jnp
from jax.experimental import pallas as pl
from jax.experimental.pallas import tpu as pltpu


# ----------------------------- Pallas kernel --------------------------------


def _patch_embed_kernel(x_ref, w_ref, b_ref, o_ref):
    # x_ref: (TM, HW)   w_ref: (HW, E)   b_ref: (1, E)   o_ref: (TM, E)
    acc = jnp.dot(x_ref[...], w_ref[...], preferred_element_type=jnp.float32)
    o_ref[...] = (acc + b_ref[...].astype(jnp.float32)).astype(o_ref.dtype)


# ----------------------------- tiling helpers --------------------------------


def _vmem_budget_bytes():
    # Half of physical VMEM (64 MiB on v5e/v6e, 32 MiB on v7x); conservative
    # fallback if hardware info is unavailable at trace time.
    try:
        phys = pltpu.get_tpu_info().vmem_capacity_bytes
    except Exception:
        phys = 64 * 1024 * 1024
    return max(phys // 2, 16 * 1024 * 1024)


def _pick_m_tile(M, HW, E, x_itemsize, w_itemsize, vmem_budget):
    """Largest M tile (rows) whose double-buffered x/out tiles plus the
    resident weight fit the VMEM budget.  Multiple of 8 (sublane); the grid
    uses cdiv so M need not divide evenly."""
    per_row = 2 * (HW + E) * x_itemsize            # double-buffered x + out rows
    fixed = 2 * HW * E * w_itemsize + 4096         # resident weight (+ bias/headroom)
    tm = 8
    for cand in (4096, 2048, 1024, 512, 256, 128, 64, 32, 16, 8):
        if fixed + cand * per_row <= vmem_budget:
            tm = cand
            break
    m_ceil = -(-M // 8) * 8                        # don't exceed what M needs
    return max(8, min(tm, m_ceil))


# ----------------------------- wrapper ---------------------------------------


def prepare_patch_embedding_params(weight, bias, *, param_dtype=None):
    """One-time parameter prep, hoisted out of the per-call path.

    weight: (E, HW) in PyTorch nn.Linear layout; bias: (E,).
    Returns (wt, b2): wt laid out (HW, E) (lane axis = embedding), optionally
    stored in a narrower dtype (e.g. bf16) to halve its HBM stream; bias is
    kept f32 and added in f32 inside the kernel.
    """
    E, HW = weight.shape
    assert bias.shape == (E,)
    wt = weight.T
    if param_dtype is not None:
        wt = wt.astype(param_dtype)
    b2 = bias.reshape(1, E).astype(jnp.float32)
    return wt, b2


def patch_embedding_forward(x, wt, b2):
    """x: (B, C, H, W); wt: (H*W, E) prepared weight; b2: (1, E) f32 bias."""
    B, C, H, W = x.shape
    HW = H * W
    E = wt.shape[1]
    assert wt.shape[0] == HW and b2.shape == (1, E)

    M = B * C
    xf = x.reshape(M, HW)                 # fold batch+channel into matmul M dim

    x_item = jnp.dtype(x.dtype).itemsize
    w_item = jnp.dtype(wt.dtype).itemsize
    budget = _vmem_budget_bytes()
    tm = _pick_m_tile(M, HW, E, x_item, w_item, budget)
    grid = (pl.cdiv(M, tm),)              # partial last tile is masked by Pallas

    # Scheduler hint: small, HBM-bound custom call.
    cost = pl.CostEstimate(
        flops=2 * M * HW * E,
        transcendentals=0,
        bytes_accessed=(M * HW * x_item + HW * E * w_item + E * 4
                        + M * E * x_item),
    )

    # Only raise the scoped-VMEM limit when the chosen tile actually needs it.
    need = 2 * tm * (HW + E) * x_item + 2 * HW * E * w_item + 4096
    compiler_kwargs = dict(
        # M tiles are fully independent.
        # TODO(synk): on v7x, switch this axis to pltpu.CORE_PARALLEL (or a
        # core_map) if cross-TensorCore sharding of large-M calls is wanted;
        # plain "parallel" vs "arbitrary" is measured-neutral.
        dimension_semantics=("parallel",),
    )
    if need > 12 * 1024 * 1024:
        compiler_kwargs["vmem_limit_bytes"] = int(budget)

    out = pl.pallas_call(
        _patch_embed_kernel,
        out_shape=jax.ShapeDtypeStruct((M, E), x.dtype),
        grid=grid,
        in_specs=[
            pl.BlockSpec((tm, HW), lambda i: (i, 0)),   # activations: tiled on M
            pl.BlockSpec((HW, E), lambda i: (0, 0)),    # weight: resident
            pl.BlockSpec((1, E), lambda i: (0, 0)),     # bias: resident
        ],
        out_specs=pl.BlockSpec((tm, E), lambda i: (i, 0)),
        compiler_params=pltpu.CompilerParams(**compiler_kwargs),
        cost_estimate=cost,
    )(xf, wt, b2)
    return out.reshape(B, C, E)


# ----------------------------- pure-JAX reference ----------------------------


def reference_forward(x, weight, bias):
    B, C, H, W = x.shape
    return x.reshape(B, C, H * W) @ weight.T + bias


# ----------------------------- main ------------------------------------------


if __name__ == "__main__":
    # Shapes consistent with PatchEmbedding(patch_h=16, patch_w=16,
    # embeding_size=32) applied to a (B=2, C=4, 16, 16) HSI input.
    B, C, H, W, E = 2, 4, 16, 16, 32

    key = jax.random.PRNGKey(0)
    kx, kw, kb = jax.random.split(key, 3)
    x = jax.random.normal(kx, (B, C, H, W), jnp.float32)
    weight = 0.02 * jax.random.normal(kw, (E, H * W), jnp.float32)
    bias = 0.02 * jax.random.normal(kb, (E,), jnp.float32)

    ref = reference_forward(x, weight, bias)

    # f32 path (matches PyTorch nn.Linear numerics).  Params prepared once.
    wt, b2 = prepare_patch_embedding_params(weight, bias)
    out = jax.block_until_ready(patch_embedding_forward(x, wt, b2))
    assert out.shape == (B, C, E), out.shape
    err_f32 = float(jnp.max(jnp.abs(out - ref)))
    assert err_f32 < 1e-4, f"f32 mismatch vs reference: max abs err {err_f32}"

    # bf16-in-HBM path: store activations and the prepared weight in bf16
    # upstream (halves the dominant HBM stream); accumulation stays f32.
    wt_bf16, b2f = prepare_patch_embedding_params(weight, bias,
                                                  param_dtype=jnp.bfloat16)
    out_bf16 = jax.block_until_ready(
        patch_embedding_forward(x.astype(jnp.bfloat16), wt_bf16, b2f))
    err_bf16 = float(jnp.max(jnp.abs(out_bf16.astype(jnp.float32) - ref)))
    assert err_bf16 < 5e-2, f"bf16 mismatch vs reference: max abs err {err_bf16}"

    print("KERNEL_OK")
</pallas_src>

<mosaic_0001>
module attributes {stable_mosaic.version = 11 : i64} {
  func.func @_patch_embed_kernel(%arg0: i32, %arg1: memref<8x256xf32, #tpu.memory_space<vmem>>, %arg2: memref<256x32xf32, #tpu.memory_space<vmem>>, %arg3: memref<1x32xf32, #tpu.memory_space<vmem>>, %arg4: memref<8x32xf32, #tpu.memory_space<vmem>>) attributes {dimension_semantics = [#tpu.dimension_semantics<parallel>], iteration_bounds = array<i64: 1>, scalar_prefetch = 0 : i64, scratch_operands = 0 : i64, tpu.core_type = #tpu.core_type<tc>, window_params = [{transform_indices = @transform_0, window_bounds = array<i64: 8, 256>}, {pipeline_mode = #tpu.pipeline_mode<synchronous>, transform_indices = @transform_1, window_bounds = array<i64: 256, 32>}, {pipeline_mode = #tpu.pipeline_mode<synchronous>, transform_indices = @transform_2, window_bounds = array<i64: 1, 32>}, {transform_indices = @transform_3, window_bounds = array<i64: 8, 32>}]} {
    %c0 = arith.constant 0 : index
    %c0_0 = arith.constant 0 : index
    %0 = vector.load %arg1[%c0, %c0_0] : memref<8x256xf32, #tpu.memory_space<vmem>>, vector<8x256xf32>
    %c0_1 = arith.constant 0 : index
    %c0_2 = arith.constant 0 : index
    %1 = vector.load %arg2[%c0_1, %c0_2] : memref<256x32xf32, #tpu.memory_space<vmem>>, vector<256x32xf32>
    %cst = arith.constant dense<0.000000e+00> : vector<8x32xf32>
    %2 = tpu.matmul %0, %1, %cst {dimension_numbers = #tpu.dot_dimension_numbers<[1], [0], [0], [1], [0, 0, 1, 1], [], []>} : vector<8x256xf32>, vector<256x32xf32>, vector<8x32xf32> -> vector<8x32xf32>
    %c0_3 = arith.constant 0 : index
    %c0_4 = arith.constant 0 : index
    %3 = vector.load %arg3[%c0_3, %c0_4] : memref<1x32xf32, #tpu.memory_space<vmem>>, vector<1x32xf32>
    %4 = vector.broadcast %3 : vector<1x32xf32> to vector<8x32xf32>
    %5 = arith.addf %2, %4 : vector<8x32xf32>
    %c0_5 = arith.constant 0 : index
    %c0_6 = arith.constant 0 : index
    %6 = vector.load %arg4[%c0_5, %c0_6] : memref<8x32xf32, #tpu.memory_space<vmem>>, vector<8x32xf32>
    tpu.vector_store %arg4[%c0_5, %c0_6], %5 {strides = array<i32>} : memref<8x32xf32, #tpu.memory_space<vmem>>, vector<8x32xf32>,
    return
  }
  func.func @transform_0(%arg0: i32) -> (i32, i32) {
    %c0_i32 = arith.constant 0 : i32
    %c0_i32_0 = arith.constant 0 : i32
    return %arg0, %c0_i32 : i32, i32
  }
  func.func @transform_1(%arg0: i32) -> (i32, i32) {
    %c0_i32 = arith.constant 0 : i32
    %c0_i32_0 = arith.constant 0 : i32
    %c0_i32_1 = arith.constant 0 : i32
    return %c0_i32, %c0_i32_0 : i32, i32
  }
  func.func @transform_2(%arg0: i32) -> (i32, i32) {
    %c0_i32 = arith.constant 0 : i32
    %c0_i32_0 = arith.constant 0 : i32
    %c0_i32_1 = arith.constant 0 : i32
    return %c0_i32, %c0_i32_0 : i32, i32
  }
  func.func @transform_3(%arg0: i32) -> (i32, i32) {
    %c0_i32 = arith.constant 0 : i32
    %c0_i32_0 = arith.constant 0 : i32
    return %arg0, %c0_i32 : i32, i32
  }
}

</mosaic_0001>

<bundles_post_ra>
// kernel: tpu_custom_call.1
= control target key start
LH: loop header
LB: loop body
LE: loop exit
PB: predicated region body
PF: predicated region fallthrough
CT: control target
= control target key end

     0   :  { %s268_s0 = inlined_call_operand.vmem [shape: f32[8,256], index: 0, kind: input, shape index: {}]   ;;  %s269_s1 = inlined_call_operand.vmem [shape: f32[256,32], index: 1, kind: input, shape index: {}]   ;;  %s270_s2 = inlined_call_operand.vmem [shape: f32[1,32], index: 2, kind: input, shape index: {}]   ;;  %s271_s3 = inlined_call_operand.hbm [shape: f32[8,32], index: 3, kind: output, shape index: {}]  }
   0x1   :  { %v32_v0 = vld [vmem:[%s269_s1 + $0x78] sm:$0xff]  ;;  %v31_v1 = vld [vmem:[%s269_s1 + $0x70] sm:$0xff]  ;;  %v30_v4 = vld [vmem:[%s269_s1 + $0x68] sm:$0xff] }
   0x2   :  { %v48_v2 = vld [vmem:[%s269_s1 + $0xf8] sm:$0xff]  ;;  %53 = vmatpush.msra.mxu0 %v32_v0  ;;  %v47_v3 = vld [vmem:[%s269_s1 + $0xf0] sm:$0xff]  ;;  %v46_v5 = vld [vmem:[%s269_s1 + $0xe8] sm:$0xff] }
   0x3   :  { %73 = vmatpush.msra.mxu1 %v48_v2  ;;  %v29_v6 = vld [vmem:[%s269_s1 + $0x60] sm:$0xff]  ;;  %v28_v8 = vld [vmem:[%s269_s1 + $0x58] sm:$0xff]  ;;  %v27_v10 = vld [vmem:[%s269_s1 + $0x50] sm:$0xff] }
   0x4   :  { %54 = vmatpush.msra.mxu0 %v31_v1  ;;  %v45_v7 = vld [vmem:[%s269_s1 + $0xe0] sm:$0xff]  ;;  %v44_v9 = vld [vmem:[%s269_s1 + $0xd8] sm:$0xff]  ;;  %v43_v11 = vld [vmem:[%s269_s1 + $0xd0] sm:$0xff] }
   0x5   :  { %74 = vmatpush.msra.mxu1 %v47_v3  ;;  %v26_v12 = vld [vmem:[%s269_s1 + $0x48] sm:$0xff]  ;;  %v25_v14 = vld [vmem:[%s269_s1 + $0x40] sm:$0xff] }
   0x6   :  { %55 = vmatpush.msra.mxu0 %v30_v4  ;;  %v42_v13 = vld [vmem:[%s269_s1 + $0xc8] sm:$0xff]  ;;  %v41_v15 = vld [vmem:[%s269_s1 + $0xc0] sm:$0xff] }
   0x7   :  { %75 = vmatpush.msra.mxu1 %v46_v5 }
   0x8   :  { %56 = vmatpush.msra.mxu0 %v29_v6 }
   0x9   :  { %76 = vmatpush.msra.mxu1 %v45_v7 }
   0xa   :  { %57 = vmatpush.msra.mxu0 %v28_v8 }
   0xb   :  { %77 = vmatpush.msra.mxu1 %v44_v9 }
   0xc   :  { %58 = vmatpush.msra.mxu0 %v27_v10 }
   0xd   :  { %78 = vmatpush.msra.mxu1 %v43_v11 }
   0xe   :  { %8 = vsyncpa [#allocation3], 0  ;;  %59 = vmatpush.msra.mxu0 %v26_v12  ;;  %v24_v16 = vld [vmem:[%s269_s1 + $0x38] sm:$0xff]  ;;  %v23_v18 = vld [vmem:[%s269_s1 + $0x30] sm:$0xff]  ;;  %s102_s4 = sshll.u32 %s271_s3, 4  ;;  %vm93_vm0 = vcmask 261120   ;;  %s103_s4 = int_to_ptr.hbm [resolvable:$true] %s102_s4 }
   0xf   :  { %79 = vmatpush.msra.mxu1 %v42_v13  ;;  %v40_v17 = vld [vmem:[%s269_s1 + $0xb8] sm:$0xff]  ;;  %v39_v19 = vld [vmem:[%s269_s1 + $0xb0] sm:$0xff]  ;;  %v22_v20 = vld [vmem:[%s269_s1 + $0x28] sm:$0xff] }
  0x10   :  { %60 = vmatpush.msra.mxu0 %v25_v14  ;;  %v38_v21 = vld [vmem:[%s269_s1 + $0xa8] sm:$0xff]  ;;  %v21_v22 = vld [vmem:[%s269_s1 + $0x20] sm:$0xff]  ;;  %v20_v24 = vld [vmem:[%s269_s1 + $0x18] sm:$0xff] }
  0x11   :  { %80 = vmatpush.msra.mxu1 %v41_v15  ;;  %v37_v23 = vld [vmem:[%s269_s1 + $0xa0] sm:$0xff]  ;;  %v36_v25 = vld [vmem:[%s269_s1 + $0x98] sm:$0xff]  ;;  %v19_v26 = vld [vmem:[%s269_s1 + $0x10] sm:$0xff] }
  0x12   :  { %61 = vmatpush.msra.mxu0 %v24_v16  ;;  %v35_v27 = vld [vmem:[%s269_s1 + $0x90] sm:$0xff]  ;;  %v18_v28 = vld [vmem:[%s269_s1 + $0x8] sm:$0xff]  ;;  %v17_v30 = vld [vmem:[%s269_s1] sm:$0xff] }
  0x13   :  { %81 = vmatpush.msra.mxu1 %v40_v17  ;;  %v34_v29 = vld [vmem:[%s269_s1 + $0x88] sm:$0xff]  ;;  %v33_v31 = vld [vmem:[%s269_s1 + $0x80] sm:$0xff]  ;;  %s139_s1 = smov [#allocation2]  }
  0x14   :  { %62 = vmatpush.msra.mxu0 %v23_v18  ;;  %v15_v32 = vld [vmem:[%s268_s0] sm:$0xff]  ;;  %v16_v33 = vld [vmem:[%s268_s0 + $0x8] sm:$0xff]  ;;  %s100_s28 = sshll.u32 %s139_s1, 4  ;;  %s101_s28 = int_to_ptr.vmem [resolvable:$true] %s100_s28 }
  0x15   :  { %82 = vmatpush.msra.mxu1 %v39_v19  ;;  %v112_v34 = vld [vmem:[%s270_s2] ss:$0 sm:$0xff] }
  0x16   :  { %63 = vmatpush.msra.mxu0 %v22_v20 }
  0x17   :  { %83 = vmatpush.msra.mxu1 %v38_v21 }
  0x18   :  { %64 = vmatpush.msra.mxu0 %v21_v22 }
  0x19   :  { %84 = vmatpush.msra.mxu1 %v37_v23 }
  0x1a   :  { %65 = vmatpush.msra.mxu0 %v20_v24 }
  0x1b   :  { %85 = vmatpush.msra.mxu1 %v36_v25 }
  0x1c   :  { %66 = vmatpush.msra.mxu0 %v19_v26 }
  0x1d   :  { %86 = vmatpush.msra.mxu1 %v35_v27 }
  0x1e   :  { %67 = vmatpush.msra.mxu0 %v18_v28 }
  0x1f   :  { %87 = vmatpush.msra.mxu1 %v34_v29 }
  0x20   :  { %68 = vmatpush.msra.mxu0 %v17_v30 }
  0x21   :  { %88 = vmatpush.msra.mxu1 %v33_v31  ;;  %69 = vmatmul.f32.vlgmr.msra.gmra.mxu0 %v15_v32 }
  0x22   :  { %89 = vmatmul.f32.vlgmr.msra.gmra.mxu1 %v16_v33 }
  0x9e   :  { %v70_v35 = vpop.f32.mrf.mxu0 }
  0x9f   :  { %v90_v36 = vpop.f32.mrf.mxu1  ;;  %v71_v37 = vadd.f32 %v112_v34, %v70_v35 }
  0xa1   :  { %v91_v38 = vadd.f32 %v90_v36, %v71_v37 }
  0xa3   :  { %94 = vst.msk [vmem:[#allocation2] sm:$0xff] %vm93_vm0, %v91_v38 }
  0xa4   :  { %105 = dma.vmem_to_hbm [thread:$0]  %s101_s28, 128, %s103_s4, [#allocation3]  }
  0xa5   :  { %137 = dma.done.wait [#allocation3], 128  }
  0xa6   :  { %138 = vsyncadd [#allocation3], 4294967168 }
  0xa7   :  { %110 = vsyncpa [#allocation3], 1 }

</bundles_post_ra>
